<compile_context>
chip_gen: v7x
topology: tpu7x:2x2x1
jax: 0.10.0
libtpu: 0.0.40
codegen_flags: <defaults>
</compile_context>

<pallas_src>
import functools

import jax
import jax.numpy as jnp
from jax import lax
from jax.experimental import pallas as pl
from jax.experimental.pallas import tpu as pltpu


def _round_up(x, m):
    return ((x + m - 1) // m) * m


def _linear_heads_kernel(h_ref, w_ref, b_ref, o_ref, *, n_chunks, chunk):
    """One row tile of  o = (h @ w + b).T  (output stored transposed, lane-dense).

    h_ref: (TM, H)   w_ref: (H, N)   b_ref: (N, 1) f32   o_ref: (N, TM)
    TM is processed in `chunk`-row sub-chunks so the (chunk, N) f32 MXU result
    (N in {2,4}) never holds many vregs before the small XLU transpose + store.
    """
    w = w_ref[...]
    b = b_ref[...]                                   # (N, 1) f32, broadcasts over TM

    def body(c, carry):
        start = pl.multiple_of(c * chunk, chunk)     # chunk is a multiple of 128
        hs = h_ref[pl.ds(start, chunk), :]           # (chunk, H)
        acc = jnp.dot(hs, w, preferred_element_type=jnp.float32)   # (chunk, N)
        o_ref[:, pl.ds(start, chunk)] = (acc.T + b).astype(o_ref.dtype)
        return carry

    if n_chunks == 1:
        acc = jnp.dot(h_ref[...], w, preferred_element_type=jnp.float32)
        o_ref[...] = (acc.T + b).astype(o_ref.dtype)
    else:
        lax.fori_loop(0, n_chunks, body, 0, unroll=True)


def linear_heads(h, weight, bias, *,
                 tm_max=2048,
                 h_tile_budget_bytes=32 << 20,
                 min_rows_for_kernel=4096,
                 out_dtype=None):
    """Computes h @ weight.T + bias (== torch nn.Linear) for small-N_out heads.

    h: (..., H), weight: (N, H), bias: (N,)  ->  (..., N) in `out_dtype`
    (defaults to h.dtype; pass jnp.float32 to keep f32 logits from bf16 inputs).

    tm_max / h_tile_budget_bytes: the row tile TM is the largest multiple of 256
    <= tm_max whose *double-buffered* activation tiles fit h_tile_budget_bytes.
    The scoped-VMEM limit is then set explicitly from the padded buffer sizes, so
    the same defaults are safe on v5e/v6e (128 MiB VMEM) and v7x (64 MiB).
    min_rows_for_kernel: below this row count use plain XLA (fixed pallas_call +
    per-grid-step overhead dwarfs the work for tiny inputs).
    """
    n_out, hidden = weight.shape
    lead = h.shape[:-1]
    out_dtype = h.dtype if out_dtype is None else jnp.dtype(out_dtype)
    h2d = h.reshape(-1, hidden)                      # (M, H)
    m = h2d.shape[0]

    if m < min_rows_for_kernel:                      # small-M fast path (plain XLA)
        out = (h2d.astype(jnp.float32) @ weight.T.astype(jnp.float32)
               + bias.astype(jnp.float32))
        return out.astype(out_dtype).reshape(*lead, n_out)

    in_itemsize = h2d.dtype.itemsize
    # H-aware row tile: biggest multiple of 256 whose 2 buffers fit the budget.
    tm = max(256, min(tm_max,
                      (h_tile_budget_bytes // (2 * hidden * in_itemsize))
                      // 256 * 256))
    tm_eff = tm if m >= tm else m                    # small M -> single full block
    grid_m = pl.cdiv(m, tm_eff)

    # In-kernel sub-chunk size (multiple of 8 sublanes / 128 lanes when possible).
    if tm_eff % 256 == 0:
        chunk = 256
    elif tm_eff % 128 == 0:
        chunk = 128
    else:
        chunk = tm_eff
    n_chunks = tm_eff // chunk

    # Explicit scoped-VMEM budget from (padded) double-buffered blocks + margin.
    out_itemsize = jnp.dtype(out_dtype).itemsize
    h_bytes = 2 * _round_up(tm_eff, 8) * _round_up(hidden, 128) * in_itemsize
    w_bytes = 2 * _round_up(hidden, 8) * 128 * weight.dtype.itemsize  # lane-padded
    o_bytes = 2 * _round_up(n_out, 8) * _round_up(tm_eff, 128) * out_itemsize
    b_bytes = 2 * 8 * 128 * 4
    est = h_bytes + w_bytes + o_bytes + b_bytes
    margin = 8 << 20
    vmem_limit_bytes = (None if est + margin <= (16 << 20)
                        else min(est + margin, 52 << 20))   # <= 52 MiB, fits v7x

    w_hn = weight.T                                   # (H, N), grid-invariant
    b2d = bias.astype(jnp.float32).reshape(n_out, 1)  # (N, 1), grid-invariant

    kernel = functools.partial(_linear_heads_kernel, n_chunks=n_chunks, chunk=chunk)

    out_t = pl.pallas_call(
        kernel,
        out_shape=jax.ShapeDtypeStruct((n_out, m), out_dtype),
        grid_spec=pltpu.PrefetchScalarGridSpec(
            num_scalar_prefetch=0,
            grid=(grid_m,),
            in_specs=[
                pl.BlockSpec((tm_eff, hidden), lambda i: (i, 0)),   # streamed h tiles
                pl.BlockSpec((hidden, n_out), lambda i: (0, 0)),    # weights (invariant)
                pl.BlockSpec((n_out, 1), lambda i: (0, 0)),         # bias (invariant)
            ],
            out_specs=pl.BlockSpec((n_out, tm_eff), lambda i: (0, i)),  # lane-dense
        ),
        compiler_params=pltpu.CompilerParams(
            dimension_semantics=("parallel",),        # v7x: shard row tiles over TCs
            vmem_limit_bytes=vmem_limit_bytes),
    )(h2d, w_hn, b2d)

    # Tiny XLA epilogue: just transpose the (N, M) slab back and reshape.
    return out_t.T.reshape(*lead, n_out)


def tab_predictions(T, weight, bias, **kw):
    """Tab_Predictions.forward: Linear(hidden_dim, 2) over the (B,S,S,H) table."""
    return linear_heads(T, weight, bias, **kw)


def fuse_pre_prediction_params(weight_e, bias_e, weight_c, bias_c):
    """One-time param prep: fuse the two (2,H) heads into a single (4,H) head."""
    return (jnp.concatenate([weight_e, weight_c], axis=0),
            jnp.concatenate([bias_e, bias_c], axis=0))


def pre_predictions_fused(h, weight_ec, bias_ec, **kw):
    """Pre_Predictions.forward with pre-fused (4,H)/(4,) params: reads h once."""
    out = linear_heads(h, weight_ec, bias_ec, **kw)   # (..., 4)
    return out[..., :2], out[..., 2:]


def pre_predictions(h, weight_e, bias_e, weight_c, bias_c, **kw):
    """Pre_Predictions.forward: two Linear(hidden_dim, 2) heads over (B,S,H)."""
    w, b = fuse_pre_prediction_params(weight_e, bias_e, weight_c, bias_c)
    return pre_predictions_fused(h, w, b, **kw)


if __name__ == "__main__":
    # Small shapes consistent with the module: batch=2, seq=8, hidden_dim=32.
    batch, seq, hidden_dim = 2, 8, 32

    key = jax.random.PRNGKey(0)
    k_t, k_h, k_w, k_b, k_we, k_be, k_wc, k_bc, k_t2 = jax.random.split(key, 9)

    # T: pairwise table fed to Tab_Predictions; h: diagonal fed to Pre_Predictions.
    T = jax.random.normal(k_t, (batch, seq, seq, hidden_dim), dtype=jnp.float32)
    h = jax.random.normal(k_h, (batch, seq, hidden_dim), dtype=jnp.float32)

    # nn.Linear-style params: weight (2, H), bias (2,), uniform(-1/sqrt(H), 1/sqrt(H)).
    bound = 1.0 / jnp.sqrt(jnp.float32(hidden_dim))
    uni = lambda k, shape: jax.random.uniform(k, shape, jnp.float32, -bound, bound)
    w_tab, b_tab = uni(k_w, (2, hidden_dim)), uni(k_b, (2,))
    w_e, b_e = uni(k_we, (2, hidden_dim)), uni(k_be, (2,))
    w_c, b_c = uni(k_wc, (2, hidden_dim)), uni(k_bc, (2,))

    # Force the Pallas path at these tiny demo sizes (min_rows_for_kernel=0);
    # in production the default keeps tiny inputs on the plain-XLA fast path.
    couples_pred = tab_predictions(T, w_tab, b_tab, min_rows_for_kernel=0)
    w_ec, b_ec = fuse_pre_prediction_params(w_e, b_e, w_c, b_c)   # one-time prep
    pred_e, pred_c = pre_predictions_fused(h, w_ec, b_ec, min_rows_for_kernel=0)

    # Extra check: multi-tile grid with a partial edge block and the in-kernel
    # chunk loop (M = 2*19*19 = 722 rows, TM = 512 -> 2 blocks, 2 chunks each).
    T_edge = jax.random.normal(k_t2, (batch, 19, 19, hidden_dim), dtype=jnp.float32)
    couples_edge = tab_predictions(T_edge, w_tab, b_tab,
                                   min_rows_for_kernel=0, tm_max=512)

    couples_pred, pred_e, pred_c, couples_edge = jax.block_until_ready(
        (couples_pred, pred_e, pred_c, couples_edge))

    # Reference check against plain JAX (same semantics as torch nn.Linear).
    ref_tab = T @ w_tab.T + b_tab
    ref_e = h @ w_e.T + b_e
    ref_c = h @ w_c.T + b_c
    ref_edge = T_edge @ w_tab.T + b_tab

    assert couples_pred.shape == (batch, seq, seq, 2)
    assert pred_e.shape == (batch, seq, 2)
    assert pred_c.shape == (batch, seq, 2)
    assert couples_edge.shape == (batch, 19, 19, 2)
    assert jnp.allclose(couples_pred, ref_tab, atol=1e-5, rtol=1e-5)
    assert jnp.allclose(pred_e, ref_e, atol=1e-5, rtol=1e-5)
    assert jnp.allclose(pred_c, ref_c, atol=1e-5, rtol=1e-5)
    assert jnp.allclose(couples_edge, ref_edge, atol=1e-5, rtol=1e-5)

    print("KERNEL_OK")
</pallas_src>

<mosaic_0001>
module attributes {stable_mosaic.version = 11 : i64} {
  func.func @_linear_heads_kernel(%arg0: i32, %arg1: memref<128x32xf32, #tpu.memory_space<vmem>>, %arg2: memref<32x2xf32, #tpu.memory_space<vmem>>, %arg3: memref<2x1xf32, #tpu.memory_space<vmem>>, %arg4: memref<2x128xf32, #tpu.memory_space<vmem>>) attributes {dimension_semantics = [#tpu.dimension_semantics<parallel>], iteration_bounds = array<i64: 1>, scalar_prefetch = 0 : i64, scratch_operands = 0 : i64, tpu.core_type = #tpu.core_type<tc>, window_params = [{transform_indices = @transform_0, window_bounds = array<i64: 128, 32>}, {pipeline_mode = #tpu.pipeline_mode<synchronous>, transform_indices = @transform_1, window_bounds = array<i64: 32, 2>}, {pipeline_mode = #tpu.pipeline_mode<synchronous>, transform_indices = @transform_2, window_bounds = array<i64: 2, 1>}, {transform_indices = @transform_3, window_bounds = array<i64: 2, 128>}]} {
    %c0 = arith.constant 0 : index
    %c0_0 = arith.constant 0 : index
    %0 = vector.load %arg2[%c0, %c0_0] : memref<32x2xf32, #tpu.memory_space<vmem>>, vector<32x2xf32>
    %c0_1 = arith.constant 0 : index
    %c0_2 = arith.constant 0 : index
    %1 = vector.load %arg3[%c0_1, %c0_2] : memref<2x1xf32, #tpu.memory_space<vmem>>, vector<2x1xf32>
    %c0_3 = arith.constant 0 : index
    %c0_4 = arith.constant 0 : index
    %2 = vector.load %arg1[%c0_3, %c0_4] : memref<128x32xf32, #tpu.memory_space<vmem>>, vector<128x32xf32>
    %cst = arith.constant dense<0.000000e+00> : vector<128x2xf32>
    %3 = tpu.matmul %2, %0, %cst {dimension_numbers = #tpu.dot_dimension_numbers<[1], [0], [0], [1], [0, 0, 1, 1], [], []>} : vector<128x32xf32>, vector<32x2xf32>, vector<128x2xf32> -> vector<128x2xf32>
    %4 = tpu.transpose %3, [1, 0] : vector<128x2xf32> -> vector<2x128xf32>
    %5 = vector.broadcast %1 : vector<2x1xf32> to vector<2x128xf32>
    %6 = arith.addf %4, %5 : vector<2x128xf32>
    %c0_5 = arith.constant 0 : index
    %c0_6 = arith.constant 0 : index
    %7 = vector.load %arg4[%c0_5, %c0_6] : memref<2x128xf32, #tpu.memory_space<vmem>>, vector<2x128xf32>
    tpu.vector_store %arg4[%c0_5, %c0_6], %6 {strides = array<i32>} : memref<2x128xf32, #tpu.memory_space<vmem>>, vector<2x128xf32>,
    return
  }
  func.func @transform_0(%arg0: i32) -> (i32, i32) {
    %c0_i32 = arith.constant 0 : i32
    %c0_i32_0 = arith.constant 0 : i32
    return %arg0, %c0_i32 : i32, i32
  }
  func.func @transform_1(%arg0: i32) -> (i32, i32) {
    %c0_i32 = arith.constant 0 : i32
    %c0_i32_0 = arith.constant 0 : i32
    %c0_i32_1 = arith.constant 0 : i32
    return %c0_i32, %c0_i32_0 : i32, i32
  }
  func.func @transform_2(%arg0: i32) -> (i32, i32) {
    %c0_i32 = arith.constant 0 : i32
    %c0_i32_0 = arith.constant 0 : i32
    %c0_i32_1 = arith.constant 0 : i32
    return %c0_i32, %c0_i32_0 : i32, i32
  }
  func.func @transform_3(%arg0: i32) -> (i32, i32) {
    %c0_i32 = arith.constant 0 : i32
    %c0_i32_0 = arith.constant 0 : i32
    return %c0_i32, %arg0 : i32, i32
  }
}

</mosaic_0001>

<bundles_post_ra>
// kernel: tpu_custom_call.1
= control target key start
LH: loop header
LB: loop body
LE: loop exit
PB: predicated region body
PF: predicated region fallthrough
CT: control target
= control target key end

     0   :  { %vm36_vm0 = vcmask 261120   ;;  %v390_v6 = vmov 0   ;;  %s503_s0 = inlined_call_operand.vmem [shape: f32[128,32], index: 0, kind: input, shape index: {}]   ;;  %s504_s1 = inlined_call_operand.vmem [shape: f32[32,2], index: 1, kind: input, shape index: {}]   ;;  %s505_s2 = inlined_call_operand.vmem [shape: f32[2,1], index: 2, kind: input, shape index: {}]   ;;  %s506_s3 = inlined_call_operand.hbm [shape: f32[2,128], index: 3, kind: output, shape index: {}]  }
   0x1   :  { %v15_v0 = vld [vmem:[%s504_s1] sm:$0xff]  ;;  %v16_v1 = vld [vmem:[%s504_s1 + $0x8] sm:$0xff]  ;;  %v17_v2 = vld [vmem:[%s504_s1 + $0x10] sm:$0xff]  ;;  %365 = vset.pattern.permute.xlu0 %v390_v6 }
   0x2   :  { %v351_v3 = vpack.c.bf16 %v16_v1, %v15_v0  ;;  %v18_v4 = vld [vmem:[%s504_s1 + $0x18] sm:$0xff]  ;;  %v20_v5 = vld [vmem:[%s503_s0] sm:$0xff] }
   0x3   :  { %v355_v7 = vpack.c.bf16 %v18_v4, %v17_v2  ;;  %327 = vmatprep.mubr.msk.f32.mxu0 %vm36_vm0, %v20_v5  ;;  %v28_v8 = vld [vmem:[%s503_s0 + $0x40] sm:$0xff] }
   0x4   :  { %352 = vmatprep.subr.bf16.mxu0 %v351_v3  ;;  %359 = vmatprep.subr.bf16.mxu1 %v351_v3  ;;  %v19_v9 = vld [vmem:[%s505_s2] sm:$0x3] }
   0x5   :  { %354 = vmatpush3.bf16.msra.mxu0 %v351_v3  ;;  %361 = vmatpush3.bf16.msra.mxu1 %v351_v3 }
   0x6   :  { %356 = vmatprep.subr.bf16.mxu0 %v355_v7  ;;  %360 = vmatprep.subr.bf16.mxu1 %v355_v7 }
   0x7   :  { %339 = vmatprep.mubr.msk.f32.mxu1 %vm36_vm0, %v28_v8  ;;  %264 = vperm.xlu0 %365, %v19_v9  }
   0x8   :  { %8 = vsyncpa [#allocation3], 0  ;;  %v21_v10 = vld [vmem:[%s503_s0 + $0x8] sm:$0xff]  ;;  %v22_v12 = vld [vmem:[%s503_s0 + $0x10] sm:$0xff] }
   0x9   :  { %358 = vmatpush3.bf16.msra.mxu0 %v355_v7  ;;  %362 = vmatpush3.bf16.msra.mxu1 %v355_v7  ;;  %v29_v11 = vld [vmem:[%s503_s0 + $0x48] sm:$0xff]  ;;  %v30_v13 = vld [vmem:[%s503_s0 + $0x50] sm:$0xff]  ;;  %v23_v14 = vld [vmem:[%s503_s0 + $0x18] sm:$0xff] }
   0xa   :  { %v31_v15 = vld [vmem:[%s503_s0 + $0x58] sm:$0xff]  ;;  %v24_v16 = vld [vmem:[%s503_s0 + $0x20] sm:$0xff]  ;;  %v25_v18 = vld [vmem:[%s503_s0 + $0x28] sm:$0xff] }
   0xb   :  { %v32_v17 = vld [vmem:[%s503_s0 + $0x60] sm:$0xff]  ;;  %v33_v19 = vld [vmem:[%s503_s0 + $0x68] sm:$0xff]  ;;  %v26_v20 = vld [vmem:[%s503_s0 + $0x30] sm:$0xff] }
   0xc   :  { %328 = vmatmul.mubr.msk.f32.vlgmr.msra.gmra.mrb[0].mxu0 %vm36_vm0, %v21_v10  ;;  %340 = vmatmul.mubr.msk.f32.vlgmr.msra.gmra.mrb[0].mxu1 %vm36_vm0, %v29_v11  ;;  %v34_v21 = vld [vmem:[%s503_s0 + $0x70] sm:$0xff]  ;;  %v27_v22 = vld [vmem:[%s503_s0 + $0x38] sm:$0xff] }
   0xd   :  { %330 = vmatprep.mubr.msk.f32.mxu0 %vm36_vm0, %v22_v12  ;;  %342 = vmatprep.mubr.msk.f32.mxu1 %vm36_vm0, %v30_v13  ;;  %v35_v23 = vld [vmem:[%s503_s0 + $0x78] sm:$0xff]  ;;  %s391_s0 = smov [#allocation2]  }
   0xe   :  { %s275_s24 = sshll.u32 %s391_s0, 4  ;;  %s276_s24 = int_to_ptr.vmem [resolvable:$true] %s275_s24 }
   0xf   :  { %s366_s25 = scalar_lea.vmem %s276_s24, 32  ;;  %p371_p1 = scmp.lt.s32.totalorder %s276_s24, %s276_s24 }
  0x10   :  { %331 = vmatmul.mubr.msk.f32.gmra.mrb[2].mxu0 %vm36_vm0, %v23_v14  ;;  %343 = vmatmul.mubr.msk.f32.gmra.mrb[2].mxu1 %vm36_vm0, %v31_v15  ;;  %p367_p0 = scmp.ne.s32.totalorder %s276_s24, %s366_s25  ;;  %p372_p2 = scmp.lt.s32.totalorder %s366_s25, %s366_s25 }
  0x11   :  { %333 = vmatprep.mubr.msk.f32.mxu0 %vm36_vm0, %v24_v16  ;;  %345 = vmatprep.mubr.msk.f32.mxu1 %vm36_vm0, %v32_v17 }
  0x12   :  { %p373_p3 = por %p372_p2, %p371_p1 }
  0x14   :  { %334 = vmatmul.mubr.msk.f32.gmra.mrb[4].mxu0 %vm36_vm0, %v25_v18  ;;  %346 = vmatmul.mubr.msk.f32.gmra.mrb[4].mxu1 %vm36_vm0, %v33_v19  ;;  %p374_p4 = pnand %p373_p3, %p367_p0 }
  0x15   :  { %336 = vmatprep.mubr.msk.f32.mxu0 %vm36_vm0, %v26_v20  ;;  %348 = vmatprep.mubr.msk.f32.mxu1 %vm36_vm0, %v34_v21 }
  0x18   :  { %337 = vmatmul.mubr.msk.f32.gmra.mrb[6].mxu0 %vm36_vm0, %v27_v22  ;;  %349 = vmatmul.mubr.msk.f32.gmra.mrb[6].mxu1 %vm36_vm0, %v35_v23 }
  0x86   :  { %v265_v40 = vpop.permute.xlu0 %264 }
  0xdf   :  { %v329_v24 = vpop.f32.mrb[0].mxu0  ;;  %v341_v25 = vpop.f32.mrb[0].mxu1 }
  0xe0   :  { %v151_v26 = vpop.f32.mrb[1].mxu0  ;;  %v191_v27 = vpop.f32.mrb[1].mxu1 }
  0xe1   :  { %230 = vxpose.xlu0.b32.start [1/16] (narrow) %v151_v26, 8 }
  0xe3   :  { %v332_v28 = vpop.f32.mrb[2].mxu0  ;;  %v344_v29 = vpop.f32.mrb[2].mxu1 }
  0xe4   :  { %v161_v30 = vpop.f32.mrb[3].mxu0  ;;  %v201_v31 = vpop.f32.mrb[3].mxu1 }
  0xe5   :  { %231 = vxpose.xlu0.b32.cont [2/16] (narrow) %v329_v24, 8 }
  0xe7   :  { %v335_v32 = vpop.f32.mrb[4].mxu0  ;;  %v347_v33 = vpop.f32.mrb[4].mxu1 }
  0xe8   :  { %v171_v34 = vpop.f32.mrb[5].mxu0  ;;  %v211_v35 = vpop.f32.mrb[5].mxu1 }
  0xe9   :  { %232 = vxpose.xlu0.b32.cont [3/16] (narrow) %v161_v30, 8 }
  0xeb   :  { %v338_v36 = vpop.f32.mrb[6].mxu0  ;;  %v350_v37 = vpop.f32.mrb[6].mxu1 }
  0xec   :  { %v181_v38 = vpop.f32.mrb[7].mxu0  ;;  %v221_v39 = vpop.f32.mrb[7].mxu1 }
  0xed   :  { %233 = vxpose.xlu0.b32.cont [4/16] (narrow) %v332_v28, 8 }
  0xf1   :  { %234 = vxpose.xlu0.b32.cont [5/16] (narrow) %v171_v34, 8 }
  0xf5   :  { %235 = vxpose.xlu0.b32.cont [6/16] (narrow) %v335_v32, 8 }
  0xf9   :  { %236 = vxpose.xlu0.b32.cont [7/16] (narrow) %v181_v38, 8 }
  0xfd   :  { %237 = vxpose.xlu0.b32.cont [8/16] (narrow) %v338_v36, 8 }
 0x101   :  { %238 = vxpose.xlu0.b32.cont [9/16] (narrow) %v191_v27, 8 }
 0x105   :  { %239 = vxpose.xlu0.b32.cont [10/16] (narrow) %v341_v25, 8 }
 0x109   :  { %240 = vxpose.xlu0.b32.cont [11/16] (narrow) %v201_v31, 8 }
 0x10d   :  { %241 = vxpose.xlu0.b32.cont [12/16] (narrow) %v344_v29, 8 }
 0x111   :  { %242 = vxpose.xlu0.b32.cont [13/16] (narrow) %v211_v35, 8 }
 0x115   :  { %243 = vxpose.xlu0.b32.cont [14/16] (narrow) %v347_v33, 8 }
 0x119   :  { %244 = vxpose.xlu0.b32.cont [15/16] (narrow) %v221_v39, 8 }
 0x11d   :  { %245 = vxpose.xlu0.b32.end [16/16] (narrow) %v350_v37, 8 }
 0x161   :  { %v246_v41 = vpop.trf.xlu0 }
 0x162   :  { %v267_v42 = vadd.f32 %v265_v40, %v246_v41 }
 0x164   :  { %268 = vst [vmem:[#allocation2] sm:$0x3] %v267_v42 }
 0x165   :  { %377 = shalt.err (!%p374_p4)
}
 0x166   :  { %s378_s28 = scalar_lea.hbm %s506_s3, 32 }
 0x167   :  { %p379_p5 = scmp.ne.s32.totalorder %s506_s3, %s378_s28  ;;  %p382_p6 = scmp.lt.u32.totalorder %s378_s28, %s506_s3 }
 0x169   :  { %p384_p7 = pnand %p382_p6, %p379_p5 }
 0x16b   :  { %387 = shalt.err (!%p384_p7)
}
 0x16c   :  { %278 = dma.vmem_to_hbm [thread:$0]  %s276_s24, 32, %s506_s3, [#allocation3]  }
 0x16d   :  { %388 = dma.done.wait [#allocation3], 32  }
 0x16e   :  { %389 = vsyncadd [#allocation3], 4294967264 }
 0x16f   :  { %282 = vsyncpa [#allocation3], 1 }

</bundles_post_ra>
